<compile_context>
chip_gen: v7x
topology: tpu7x:2x2x1
jax: 0.10.0
libtpu: 0.0.40
codegen_flags: <defaults>
</compile_context>

<pallas_src>
import functools

import numpy as np
import jax
import jax.numpy as jnp
from jax.experimental import pallas as pl
from jax.experimental.pallas import tpu as pltpu


def _round_up(v, m):
    return ((v + m - 1) // m) * m


def _partial_conv_kernel(x_ref, w_ref, b_ref, o_ref, xcol_ref, *,
                         kh, kw, cin_pad, wp, hwp, bb):
    """One grid step = `bb` batch elements, one fused MXU GEMM.

    x_ref    : (bb, Cin_pad, L)             flattened zero-padded images
                                            (row-major over (Hp_tot, Wp_tot);
                                            extra bottom rows keep taps in-bounds)
    w_ref    : (Cout_pad, KH*KW*Cin_pad)    im2col weight matrix (zero-padded)
    b_ref    : (Cout_pad, 1)                sliced bias (zero-padded)
    o_ref    : (bb, Cout_pad, H*Wp_tot)     lane-dense, (8,128)-tiled output
    xcol_ref : (KH*KW*Cin_pad, bb*H*Wp_tot) VMEM im2col slab (8-sublane taps)
    """
    for b in range(bb):
        x = x_ref[b]                                       # (Cin_pad, L)
        for t in range(kh * kw):
            i, j = divmod(t, kw)
            s = i * wp + j
            # Full 8-sublane, lane-aligned store for (tap t, batch b).
            xcol_ref[t * cin_pad:(t + 1) * cin_pad,
                     b * hwp:(b + 1) * hwp] = x[:, s:s + hwp]
    # One MXU GEMM over the whole contraction (K = KH*KW*Cin_pad) and the
    # whole lane dim (bb * H*Wp_tot); bias is a VPU add after the GEMM.
    y = jnp.dot(w_ref[...], xcol_ref[...],
                preferred_element_type=jnp.float32) + b_ref[...]
    for b in range(bb):
        o_ref[b] = y[:, b * hwp:(b + 1) * hwp].astype(o_ref.dtype)


def partial_conv2d(x_nchw, weight_full, bias_full, out_channel_begin,
                   out_channel_end, padding=1, grid_steps=1):
    """Forward pass of PartialConv2d (stride=1, symmetric 'same' padding).

    x_nchw      : (N, Cin, H, W)
    weight_full : (Cout_full, Cin, KH, KW)   PyTorch OIHW layout
    bias_full   : (Cout_full,)
    grid_steps  : number of ("parallel") grid steps the batch is split over.
                  1  -> single step (best on single-TC v5e/v6e),
                  2+ -> batch-sharded steps (feeds v7x's two TensorCores).
    """
    # --- parameter slicing (what PartialConv2d.__init__ does) ----------------
    w = weight_full[out_channel_begin:out_channel_end]      # (Cout, Cin, KH, KW)
    b = bias_full[out_channel_begin:out_channel_end]        # (Cout,)
    cout, cin, kh, kw = w.shape
    n, _, h, wid = x_nchw.shape
    # TODO(synk): stride=1 and symmetric 'same'-style padding assumed (matches
    # the module config); other Conv2d strides/paddings are not generalized.
    assert n % grid_steps == 0
    bb = n // grid_steps

    cin_pad = _round_up(cin, 8)          # 8-sublane-aligned tap rows
    cout_pad = _round_up(cout, 8)        # full-sublane output tiles

    # Choose the padded width so the flattened output lane dim H*Wp_tot is a
    # multiple of 128 (unmasked lane-dense stores).  Falls back to the minimal
    # width if no aligned width exists nearby (still correct, just slower).
    wp_base = wid + 2 * padding
    wp_tot = wp_base
    while (h * wp_tot) % 128 != 0 and wp_tot < wp_base + 128:
        wp_tot += 1
    if (h * wp_tot) % 128 != 0:
        wp_tot = wp_base
    hwp = h * wp_tot                                         # output lane dim

    # Extra bottom rows so every tap window [s, s + hwp) stays in-bounds.
    l_min = hwp + (kh - 1) * wp_tot + (kw - 1)
    hp_base = h + 2 * padding
    extra_h = max(0, -(-(l_min - hp_base * wp_tot) // wp_tot))
    hp_tot = hp_base + extra_h
    l_tot = hp_tot * wp_tot

    # ONE pad op: zero channel pad + spatial pad + tail rows, then a free
    # row-major reshape to the flattened lane layout (NCHW kept, no transposes).
    x_pad = jnp.pad(
        x_nchw,
        ((0, 0),
         (0, cin_pad - cin),
         (padding, padding + extra_h),
         (padding, wp_tot - wid - padding)))
    x_flat = x_pad.reshape(n, cin_pad, l_tot)                # (N, Cin_pad, L)

    # Weight -> (Cout_pad, KH*KW*Cin_pad), tap-major / channel-minor to match
    # the in-kernel im2col row order; zero rows/cols for the padding so the
    # padded channels / out-channels contribute exactly zero.
    w_tap = jnp.transpose(w, (0, 2, 3, 1))                   # (Cout, KH, KW, Cin)
    w_tap = jnp.pad(w_tap, ((0, cout_pad - cout), (0, 0), (0, 0),
                            (0, cin_pad - cin)))
    w_mat = w_tap.reshape(cout_pad, kh * kw * cin_pad)
    b_mat = jnp.pad(b, (0, cout_pad - cout)).reshape(cout_pad, 1)

    kernel = functools.partial(
        _partial_conv_kernel, kh=kh, kw=kw, cin_pad=cin_pad, wp=wp_tot,
        hwp=hwp, bb=bb)

    out_flat = pl.pallas_call(
        kernel,
        out_shape=jax.ShapeDtypeStruct((n, cout_pad, hwp), x_nchw.dtype),
        grid_spec=pltpu.PrefetchScalarGridSpec(
            num_scalar_prefetch=0,
            grid=(grid_steps,),
            in_specs=[
                pl.BlockSpec((bb, cin_pad, l_tot), lambda g: (g, 0, 0)),
                pl.BlockSpec((cout_pad, kh * kw * cin_pad), lambda g: (0, 0)),
                pl.BlockSpec((cout_pad, 1), lambda g: (0, 0)),
            ],
            out_specs=pl.BlockSpec((bb, cout_pad, hwp), lambda g: (g, 0, 0)),
            scratch_shapes=[pltpu.VMEM((kh * kw * cin_pad, bb * hwp),
                                       jnp.float32)],
        ),
        compiler_params=pltpu.CompilerParams(
            dimension_semantics=("parallel",)),
    )(x_flat, w_mat, b_mat)

    # (N, Cout_pad, H*Wp_tot) -> (N, Cout_pad, H, Wp_tot) -> drop padded
    # out-channels and W-pad columns.  NOTE: the dropped columns (>= wid) are
    # the only outputs influenced by tap windows that wrap a flattened row
    # boundary / the extra bottom pad rows; they must remain dropped.
    return out_flat.reshape(n, cout_pad, h, wp_tot)[:, :cout, :, :wid]


def _reference_conv(x_nchw, weight_full, bias_full, cb, ce, padding=1):
    w = weight_full[cb:ce]
    b = bias_full[cb:ce]
    out = jax.lax.conv_general_dilated(
        x_nchw, w, window_strides=(1, 1),
        padding=((padding, padding), (padding, padding)),
        dimension_numbers=("NCHW", "OIHW", "NCHW"),
    )
    return out + b[None, :, None, None]


if __name__ == "__main__":
    # Small deterministic configuration:
    #   full conv: in_channels=4, out_channels=8, kernel=3x3, stride=1, pad=1, bias=True
    #   PartialConv2d(conv, 2, 6) -> handles output channels [2, 6) (4 channels)
    N, Cin, H, W = 2, 4, 16, 16
    Cout_full, K = 8, 3
    cb, ce = 2, 6

    key = jax.random.PRNGKey(0)
    kx, kw_, kb = jax.random.split(key, 3)
    x = jax.random.normal(kx, (N, Cin, H, W), dtype=jnp.float32)
    weight_full = jax.random.normal(kw_, (Cout_full, Cin, K, K), dtype=jnp.float32) * 0.1
    bias_full = jax.random.normal(kb, (Cout_full,), dtype=jnp.float32) * 0.1

    # Default: single grid step (batch folded into the GEMM lane dim) — best
    # on single-TensorCore v5e / v6e.
    out = jax.block_until_ready(
        partial_conv2d(x, weight_full, bias_full, cb, ce, padding=1))
    # v7x-style variant: batch sharded across 2 "parallel" grid steps so both
    # TensorCores get work.
    out2 = jax.block_until_ready(
        partial_conv2d(x, weight_full, bias_full, cb, ce, padding=1,
                       grid_steps=2))

    ref = jax.block_until_ready(_reference_conv(x, weight_full, bias_full, cb, ce))
    assert out.shape == (N, ce - cb, H, W), out.shape
    assert np.allclose(np.asarray(out), np.asarray(ref), atol=1e-4, rtol=1e-4)
    assert np.allclose(np.asarray(out2), np.asarray(ref), atol=1e-4, rtol=1e-4)

    print("KERNEL_OK")
</pallas_src>

<mosaic_0001>
module attributes {stable_mosaic.version = 11 : i64} {
  func.func @_partial_conv_kernel(%arg0: i32, %arg1: memref<2x8x456xf32, #tpu.memory_space<vmem>>, %arg2: memref<8x72xf32, #tpu.memory_space<vmem>>, %arg3: memref<8x1xf32, #tpu.memory_space<vmem>>, %arg4: memref<2x8x384xf32, #tpu.memory_space<vmem>>, %arg5: memref<72x768xf32, #tpu.memory_space<vmem>>) attributes {dimension_semantics = [#tpu.dimension_semantics<parallel>], iteration_bounds = array<i64: 1>, scalar_prefetch = 0 : i64, scratch_operands = 1 : i64, tpu.core_type = #tpu.core_type<tc>, window_params = [{transform_indices = @transform_0, window_bounds = array<i64: 2, 8, 456>}, {pipeline_mode = #tpu.pipeline_mode<synchronous>, transform_indices = @transform_1, window_bounds = array<i64: 8, 72>}, {pipeline_mode = #tpu.pipeline_mode<synchronous>, transform_indices = @transform_2, window_bounds = array<i64: 8, 1>}, {transform_indices = @transform_3, window_bounds = array<i64: 2, 8, 384>}]} {
    %c0 = arith.constant 0 : index
    %c0_0 = arith.constant 0 : index
    %c0_1 = arith.constant 0 : index
    %0 = vector.load %arg1[%c0, %c0_0, %c0_1] : memref<2x8x456xf32, #tpu.memory_space<vmem>>, vector<1x8x456xf32>
    %1 = vector.shape_cast %0 : vector<1x8x456xf32> to vector<8x456xf32>
    %2 = vector.extract_strided_slice %1 {offsets = [0, 0], sizes = [8, 384], strides = [1, 1]} : vector<8x456xf32> to vector<8x384xf32>
    %c0_2 = arith.constant 0 : index
    %c0_3 = arith.constant 0 : index
    %3 = vector.load %arg5[%c0_2, %c0_3] : memref<72x768xf32, #tpu.memory_space<vmem>>, vector<8x384xf32>
    tpu.vector_store %arg5[%c0_2, %c0_3], %2 {strides = array<i32>} : memref<72x768xf32, #tpu.memory_space<vmem>>, vector<8x384xf32>,
    %4 = vector.extract_strided_slice %1 {offsets = [0, 1], sizes = [8, 384], strides = [1, 1]} : vector<8x456xf32> to vector<8x384xf32>
    %c8 = arith.constant 8 : index
    %c0_4 = arith.constant 0 : index
    %5 = vector.load %arg5[%c8, %c0_4] : memref<72x768xf32, #tpu.memory_space<vmem>>, vector<8x384xf32>
    tpu.vector_store %arg5[%c8, %c0_4], %4 {strides = array<i32>} : memref<72x768xf32, #tpu.memory_space<vmem>>, vector<8x384xf32>,
    %6 = vector.extract_strided_slice %1 {offsets = [0, 2], sizes = [8, 384], strides = [1, 1]} : vector<8x456xf32> to vector<8x384xf32>
    %c16 = arith.constant 16 : index
    %c0_5 = arith.constant 0 : index
    %7 = vector.load %arg5[%c16, %c0_5] : memref<72x768xf32, #tpu.memory_space<vmem>>, vector<8x384xf32>
    tpu.vector_store %arg5[%c16, %c0_5], %6 {strides = array<i32>} : memref<72x768xf32, #tpu.memory_space<vmem>>, vector<8x384xf32>,
    %8 = vector.extract_strided_slice %1 {offsets = [0, 24], sizes = [8, 384], strides = [1, 1]} : vector<8x456xf32> to vector<8x384xf32>
    %c24 = arith.constant 24 : index
    %c0_6 = arith.constant 0 : index
    %9 = vector.load %arg5[%c24, %c0_6] : memref<72x768xf32, #tpu.memory_space<vmem>>, vector<8x384xf32>
    tpu.vector_store %arg5[%c24, %c0_6], %8 {strides = array<i32>} : memref<72x768xf32, #tpu.memory_space<vmem>>, vector<8x384xf32>,
    %10 = vector.extract_strided_slice %1 {offsets = [0, 25], sizes = [8, 384], strides = [1, 1]} : vector<8x456xf32> to vector<8x384xf32>
    %c32 = arith.constant 32 : index
    %c0_7 = arith.constant 0 : index
    %11 = vector.load %arg5[%c32, %c0_7] : memref<72x768xf32, #tpu.memory_space<vmem>>, vector<8x384xf32>
    tpu.vector_store %arg5[%c32, %c0_7], %10 {strides = array<i32>} : memref<72x768xf32, #tpu.memory_space<vmem>>, vector<8x384xf32>,
    %12 = vector.extract_strided_slice %1 {offsets = [0, 26], sizes = [8, 384], strides = [1, 1]} : vector<8x456xf32> to vector<8x384xf32>
    %c40 = arith.constant 40 : index
    %c0_8 = arith.constant 0 : index
    %13 = vector.load %arg5[%c40, %c0_8] : memref<72x768xf32, #tpu.memory_space<vmem>>, vector<8x384xf32>
    tpu.vector_store %arg5[%c40, %c0_8], %12 {strides = array<i32>} : memref<72x768xf32, #tpu.memory_space<vmem>>, vector<8x384xf32>,
    %14 = vector.extract_strided_slice %1 {offsets = [0, 48], sizes = [8, 384], strides = [1, 1]} : vector<8x456xf32> to vector<8x384xf32>
    %c48 = arith.constant 48 : index
    %c0_9 = arith.constant 0 : index
    %15 = vector.load %arg5[%c48, %c0_9] : memref<72x768xf32, #tpu.memory_space<vmem>>, vector<8x384xf32>
    tpu.vector_store %arg5[%c48, %c0_9], %14 {strides = array<i32>} : memref<72x768xf32, #tpu.memory_space<vmem>>, vector<8x384xf32>,
    %16 = vector.extract_strided_slice %1 {offsets = [0, 49], sizes = [8, 384], strides = [1, 1]} : vector<8x456xf32> to vector<8x384xf32>
    %c56 = arith.constant 56 : index
    %c0_10 = arith.constant 0 : index
    %17 = vector.load %arg5[%c56, %c0_10] : memref<72x768xf32, #tpu.memory_space<vmem>>, vector<8x384xf32>
    tpu.vector_store %arg5[%c56, %c0_10], %16 {strides = array<i32>} : memref<72x768xf32, #tpu.memory_space<vmem>>, vector<8x384xf32>,
    %18 = vector.extract_strided_slice %1 {offsets = [0, 50], sizes = [8, 384], strides = [1, 1]} : vector<8x456xf32> to vector<8x384xf32>
    %c64 = arith.constant 64 : index
    %c0_11 = arith.constant 0 : index
    %19 = vector.load %arg5[%c64, %c0_11] : memref<72x768xf32, #tpu.memory_space<vmem>>, vector<8x384xf32>
    tpu.vector_store %arg5[%c64, %c0_11], %18 {strides = array<i32>} : memref<72x768xf32, #tpu.memory_space<vmem>>, vector<8x384xf32>,
    %c1 = arith.constant 1 : index
    %c0_12 = arith.constant 0 : index
    %c0_13 = arith.constant 0 : index
    %20 = vector.load %arg1[%c1, %c0_12, %c0_13] : memref<2x8x456xf32, #tpu.memory_space<vmem>>, vector<1x8x456xf32>
    %21 = vector.shape_cast %20 : vector<1x8x456xf32> to vector<8x456xf32>
    %22 = vector.extract_strided_slice %21 {offsets = [0, 0], sizes = [8, 384], strides = [1, 1]} : vector<8x456xf32> to vector<8x384xf32>
    %c0_14 = arith.constant 0 : index
    %c384 = arith.constant 384 : index
    %23 = vector.load %arg5[%c0_14, %c384] : memref<72x768xf32, #tpu.memory_space<vmem>>, vector<8x384xf32>
    tpu.vector_store %arg5[%c0_14, %c384], %22 {strides = array<i32>} : memref<72x768xf32, #tpu.memory_space<vmem>>, vector<8x384xf32>,
    %24 = vector.extract_strided_slice %21 {offsets = [0, 1], sizes = [8, 384], strides = [1, 1]} : vector<8x456xf32> to vector<8x384xf32>
    %c8_15 = arith.constant 8 : index
    %c384_16 = arith.constant 384 : index
    %25 = vector.load %arg5[%c8_15, %c384_16] : memref<72x768xf32, #tpu.memory_space<vmem>>, vector<8x384xf32>
    tpu.vector_store %arg5[%c8_15, %c384_16], %24 {strides = array<i32>} : memref<72x768xf32, #tpu.memory_space<vmem>>, vector<8x384xf32>,
    %26 = vector.extract_strided_slice %21 {offsets = [0, 2], sizes = [8, 384], strides = [1, 1]} : vector<8x456xf32> to vector<8x384xf32>
    %c16_17 = arith.constant 16 : index
    %c384_18 = arith.constant 384 : index
    %27 = vector.load %arg5[%c16_17, %c384_18] : memref<72x768xf32, #tpu.memory_space<vmem>>, vector<8x384xf32>
    tpu.vector_store %arg5[%c16_17, %c384_18], %26 {strides = array<i32>} : memref<72x768xf32, #tpu.memory_space<vmem>>, vector<8x384xf32>,
    %28 = vector.extract_strided_slice %21 {offsets = [0, 24], sizes = [8, 384], strides = [1, 1]} : vector<8x456xf32> to vector<8x384xf32>
    %c24_19 = arith.constant 24 : index
    %c384_20 = arith.constant 384 : index
    %29 = vector.load %arg5[%c24_19, %c384_20] : memref<72x768xf32, #tpu.memory_space<vmem>>, vector<8x384xf32>
    tpu.vector_store %arg5[%c24_19, %c384_20], %28 {strides = array<i32>} : memref<72x768xf32, #tpu.memory_space<vmem>>, vector<8x384xf32>,
    %30 = vector.extract_strided_slice %21 {offsets = [0, 25], sizes = [8, 384], strides = [1, 1]} : vector<8x456xf32> to vector<8x384xf32>
    %c32_21 = arith.constant 32 : index
    %c384_22 = arith.constant 384 : index
    %31 = vector.load %arg5[%c32_21, %c384_22] : memref<72x768xf32, #tpu.memory_space<vmem>>, vector<8x384xf32>
    tpu.vector_store %arg5[%c32_21, %c384_22], %30 {strides = array<i32>} : memref<72x768xf32, #tpu.memory_space<vmem>>, vector<8x384xf32>,
    %32 = vector.extract_strided_slice %21 {offsets = [0, 26], sizes = [8, 384], strides = [1, 1]} : vector<8x456xf32> to vector<8x384xf32>
    %c40_23 = arith.constant 40 : index
    %c384_24 = arith.constant 384 : index
    %33 = vector.load %arg5[%c40_23, %c384_24] : memref<72x768xf32, #tpu.memory_space<vmem>>, vector<8x384xf32>
    tpu.vector_store %arg5[%c40_23, %c384_24], %32 {strides = array<i32>} : memref<72x768xf32, #tpu.memory_space<vmem>>, vector<8x384xf32>,
    %34 = vector.extract_strided_slice %21 {offsets = [0, 48], sizes = [8, 384], strides = [1, 1]} : vector<8x456xf32> to vector<8x384xf32>
    %c48_25 = arith.constant 48 : index
    %c384_26 = arith.constant 384 : index
    %35 = vector.load %arg5[%c48_25, %c384_26] : memref<72x768xf32, #tpu.memory_space<vmem>>, vector<8x384xf32>
    tpu.vector_store %arg5[%c48_25, %c384_26], %34 {strides = array<i32>} : memref<72x768xf32, #tpu.memory_space<vmem>>, vector<8x384xf32>,
    %36 = vector.extract_strided_slice %21 {offsets = [0, 49], sizes = [8, 384], strides = [1, 1]} : vector<8x456xf32> to vector<8x384xf32>
    %c56_27 = arith.constant 56 : index
    %c384_28 = arith.constant 384 : index
    %37 = vector.load %arg5[%c56_27, %c384_28] : memref<72x768xf32, #tpu.memory_space<vmem>>, vector<8x384xf32>
    tpu.vector_store %arg5[%c56_27, %c384_28], %36 {strides = array<i32>} : memref<72x768xf32, #tpu.memory_space<vmem>>, vector<8x384xf32>,
    %38 = vector.extract_strided_slice %21 {offsets = [0, 50], sizes = [8, 384], strides = [1, 1]} : vector<8x456xf32> to vector<8x384xf32>
    %c64_29 = arith.constant 64 : index
    %c384_30 = arith.constant 384 : index
    %39 = vector.load %arg5[%c64_29, %c384_30] : memref<72x768xf32, #tpu.memory_space<vmem>>, vector<8x384xf32>
    tpu.vector_store %arg5[%c64_29, %c384_30], %38 {strides = array<i32>} : memref<72x768xf32, #tpu.memory_space<vmem>>, vector<8x384xf32>,
    %c0_31 = arith.constant 0 : index
    %c0_32 = arith.constant 0 : index
    %40 = vector.load %arg2[%c0_31, %c0_32] : memref<8x72xf32, #tpu.memory_space<vmem>>, vector<8x72xf32>
    %c0_33 = arith.constant 0 : index
    %c0_34 = arith.constant 0 : index
    %41 = vector.load %arg5[%c0_33, %c0_34] : memref<72x768xf32, #tpu.memory_space<vmem>>, vector<72x768xf32>
    %cst = arith.constant dense<0.000000e+00> : vector<8x768xf32>
    %42 = tpu.matmul %40, %41, %cst {dimension_numbers = #tpu.dot_dimension_numbers<[1], [0], [0], [1], [0, 0, 1, 1], [], []>} : vector<8x72xf32>, vector<72x768xf32>, vector<8x768xf32> -> vector<8x768xf32>
    %c0_35 = arith.constant 0 : index
    %c0_36 = arith.constant 0 : index
    %43 = vector.load %arg3[%c0_35, %c0_36] : memref<8x1xf32, #tpu.memory_space<vmem>>, vector<8x1xf32>
    %44 = vector.broadcast %43 : vector<8x1xf32> to vector<8x768xf32>
    %45 = arith.addf %42, %44 : vector<8x768xf32>
    %46 = vector.extract_strided_slice %45 {offsets = [0, 0], sizes = [8, 384], strides = [1, 1]} : vector<8x768xf32> to vector<8x384xf32>
    %c0_37 = arith.constant 0 : index
    %c0_38 = arith.constant 0 : index
    %c0_39 = arith.constant 0 : index
    %47 = vector.load %arg4[%c0_37, %c0_38, %c0_39] : memref<2x8x384xf32, #tpu.memory_space<vmem>>, vector<1x8x384xf32>
    %48 = vector.shape_cast %47 : vector<1x8x384xf32> to vector<8x384xf32>
    %49 = vector.shape_cast %46 : vector<8x384xf32> to vector<1x8x384xf32>
    tpu.vector_store %arg4[%c0_37, %c0_38, %c0_39], %49 {strides = array<i32>} : memref<2x8x384xf32, #tpu.memory_space<vmem>>, vector<1x8x384xf32>,
    %50 = vector.extract_strided_slice %45 {offsets = [0, 384], sizes = [8, 384], strides = [1, 1]} : vector<8x768xf32> to vector<8x384xf32>
    %c1_40 = arith.constant 1 : index
    %c0_41 = arith.constant 0 : index
    %c0_42 = arith.constant 0 : index
    %51 = vector.load %arg4[%c1_40, %c0_41, %c0_42] : memref<2x8x384xf32, #tpu.memory_space<vmem>>, vector<1x8x384xf32>
    %52 = vector.shape_cast %51 : vector<1x8x384xf32> to vector<8x384xf32>
    %53 = vector.shape_cast %50 : vector<8x384xf32> to vector<1x8x384xf32>
    tpu.vector_store %arg4[%c1_40, %c0_41, %c0_42], %53 {strides = array<i32>} : memref<2x8x384xf32, #tpu.memory_space<vmem>>, vector<1x8x384xf32>,
    return
  }
  func.func @transform_0(%arg0: i32) -> (i32, i32, i32) {
    %c0_i32 = arith.constant 0 : i32
    %c0_i32_0 = arith.constant 0 : i32
    %c0_i32_1 = arith.constant 0 : i32
    return %arg0, %c0_i32, %c0_i32_0 : i32, i32, i32
  }
  func.func @transform_1(%arg0: i32) -> (i32, i32) {
    %c0_i32 = arith.constant 0 : i32
    %c0_i32_0 = arith.constant 0 : i32
    %c0_i32_1 = arith.constant 0 : i32
    return %c0_i32, %c0_i32_0 : i32, i32
  }
  func.func @transform_2(%arg0: i32) -> (i32, i32) {
    %c0_i32 = arith.constant 0 : i32
    %c0_i32_0 = arith.constant 0 : i32
    %c0_i32_1 = arith.constant 0 : i32
    return %c0_i32, %c0_i32_0 : i32, i32
  }
  func.func @transform_3(%arg0: i32) -> (i32, i32, i32) {
    %c0_i32 = arith.constant 0 : i32
    %c0_i32_0 = arith.constant 0 : i32
    %c0_i32_1 = arith.constant 0 : i32
    return %arg0, %c0_i32, %c0_i32_0 : i32, i32, i32
  }
}

</mosaic_0001>

<bundles_post_ra>
// kernel: tpu_custom_call.1
= control target key start
LH: loop header
LB: loop body
LE: loop exit
PB: predicated region body
PF: predicated region fallthrough
CT: control target
= control target key end

     0   :  { %8 = vsyncpa [#allocation4], 0  ;;  %s1166_s0 = inlined_call_operand.hbm [shape: f32[2,8,456], index: 0, kind: input, shape index: {}]   ;;  %s1167_s1 = inlined_call_operand.vmem [shape: f32[8,72], index: 1, kind: input, shape index: {}]   ;;  %s1168_s2 = inlined_call_operand.vmem [shape: f32[8,1], index: 2, kind: input, shape index: {}]   ;;  %s1169_s3 = inlined_call_operand.hbm [shape: f32[2,8,384], index: 3, kind: output, shape index: {}]  }
   0x1   :  { %9 = vsyncpa [#allocation5], 0  ;;  %s886_s12 = smov [#allocation3]   ;;  %s838_s16 = scalar_lea.hbm %s1166_s0, 1024 }
   0x2   :  { %s15_s13 = sshll.u32 %s886_s12, 4  ;;  %p839_p0 = scmp.ne.s32.totalorder %s1166_s0, %s838_s16  ;;  %s16_s13 = int_to_ptr.vmem [resolvable:$true] %s15_s13 }
   0x3   :  { %p842_p1 = scmp.lt.u32.totalorder %s838_s16, %s1166_s0 }
   0x5   :  { %p844_p2 = pnand %p842_p1, %p839_p0 }
   0x7   :  { %847 = shalt.err (!%p844_p2)
}
   0x8   :  { %s848_s21 = scalar_lea.vmem %s16_s13, 1024  ;;  %p853_p4 = scmp.lt.s32.totalorder %s16_s13, %s16_s13 }
   0x9   :  { %p849_p3 = scmp.ne.s32.totalorder %s16_s13, %s848_s21  ;;  %p854_p5 = scmp.lt.s32.totalorder %s848_s21, %s848_s21 }
   0xb   :  { %p855_p6 = por %p854_p5, %p853_p4 }
   0xd   :  { %p856_p7 = pnand %p855_p6, %p849_p3 }
   0xf   :  { %859 = shalt.err (!%p856_p7)
}
  0x10   :  { %s887_s22 = smov 512   ;;  %s888_s23 = smov 32  }
  0x11   :  { %21 = dma.hbm_to_vmem [thread:$0]  %s1166_s0, 1024, %s16_s13, [#allocation4], %s887_s22, %s887_s22, %s888_s23  }
  0x12   :  { %882 = dma.done.wait [#allocation4], 1024  }
  0x13   :  { %883 = vsyncadd [#allocation4], 4294966272  ;;  %v934_v0 = vld [vmem:[#allocation3 + $0x8] sm:$0xff]  ;;  %v936_v1 = vld [vmem:[#allocation3 + $0x10] sm:$0xff]  ;;  %s889_s26 = smov 126   ;;  %s890_s27 = smov 127  }
  0x14   :  { %v938_v2 = vld [vmem:[#allocation3] sm:$0xff]  ;;  %v711_v3 = vpack.i.bf16 %v936_v1, %v934_v0  ;;  %s891_s0 = smov 104   ;;  %s892_s28 = smov 102   ;;  %v32_v6 = vld [vmem:[#allocation3 + $0x18] sm:$0xff]  ;;  %v961_v8 = vld [vmem:[#allocation3 + $0x28] sm:$0xff]  ;;  %v896_v10 = vmov 0.0  }
  0x15   :  { %v942_v4 = vld [vmem:[#allocation3 + $0x20] sm:$0xff]  ;;  %s893_s29 = smov 103   ;;  %s894_s30 = smov 79   ;;  %v188_v7 = vld [vmem:[#allocation3 + $0x38] sm:$0xff]  ;;  %v963_v9 = vld [vmem:[#allocation3 + $0x30] sm:$0xff]  ;;  %461 = vmatprep.mubr.f32.mxu0 %v896_v10  ;;  %532 = vmatprep.mubr.f32.mxu1 %v896_v10  ;;  %v898_v15 = vmov 0  }
  0x16   :  { %712 = vrot.lane.b32.xlu1 %v711_v3, %s889_s26  ;;  %702 = vrot.lane.b32.xlu0 %v711_v3, %s890_s27  ;;  %v706_v5 = vpack.i.bf16 %v942_v4, %v938_v2  ;;  %s895_s4 = smov 80   ;;  %s897_s5 = smov 78   ;;  %v771_v11 = vpack.i.bf16 %v32_v6, %v188_v7  ;;  %v766_v12 = vpack.i.bf16 %v963_v9, %v961_v8  ;;  %v387_v16 = vld [vmem:[%s1168_s2] sm:$0xff]  ;;  %vm48_vm0 = vcmask 1039360  }
  0x17   :  { %v826_v13 = vpack.i.bf16 %v961_v8, %v942_v4  ;;  %v831_v14 = vpack.i.bf16 %v188_v7, %v963_v9  ;;  %836 = vset.pattern.permute.xlu1 %v898_v15  ;;  %837 = vset.pattern.permute.xlu0 %v898_v15  ;;  %vm66_vm1 = vcmask 1031168   ;;  %vm84_vm2 = vcmask 850944  }
  0x18   :  { %vm102_vm3 = vcmask 842752   ;;  %vm120_vm4 = vcmask 834560   ;;  %vm156_vm5 = vcmask 646144   ;;  %vm138_vm6 = vcmask 654336  }
  0x19   :  { %vm174_vm7 = vcmask 637952   ;;  %vm393_vm8 = vcmask 588800  }
  0x1a   :  { %717 = vrot.lane.b32.xlu1 %v711_v3, %s891_s0  ;;  %707 = vrot.lane.b32.xlu0 %v706_v5, %s890_s27 }
  0x1e   :  { %727 = vrot.lane.b32.xlu1 %v706_v5, %s891_s0  ;;  %722 = vrot.lane.b32.xlu0 %v706_v5, %s889_s26 }
  0x22   :  { %737 = vrot.lane.b32.xlu1 %v711_v3, %s892_s28  ;;  %732 = vrot.lane.b32.xlu0 %v711_v3, %s893_s29 }
  0x26   :  { %747 = vrot.lane.b32.xlu1 %v706_v5, %s892_s28  ;;  %742 = vrot.lane.b32.xlu0 %v706_v5, %s893_s29 }
  0x2a   :  { %757 = vrot.lane.b32.xlu1 %v711_v3, %s894_s30  ;;  %752 = vrot.lane.b32.xlu0 %v711_v3, %s895_s4 }
  0x2e   :  { %148 = vrot.lane.b32.xlu1 %v938_v2, %s894_s30  ;;  %762 = vrot.lane.b32.xlu0 %v706_v5, %s895_s4 }
  0x32   :  { %170 = vrot.lane.b32.xlu1 %v936_v1, %s897_s5  ;;  %168 = vrot.lane.b32.xlu0 %v934_v0, %s897_s5 }
  0x36   :  { %772 = vrot.lane.b32.xlu1 %v771_v11, %s890_s27  ;;  %767 = vrot.lane.b32.xlu0 %v766_v12, %s890_s27 }
  0x3a   :  { %777 = vrot.lane.b32.xlu1 %v766_v12, %s889_s26  ;;  %166 = vrot.lane.b32.xlu0 %v938_v2, %s897_s5 }
  0x3e   :  { %787 = vrot.lane.b32.xlu1 %v766_v12, %s891_s0  ;;  %782 = vrot.lane.b32.xlu0 %v771_v11, %s889_s26 }
  0x42   :  { %797 = vrot.lane.b32.xlu1 %v766_v12, %s893_s29  ;;  %792 = vrot.lane.b32.xlu0 %v771_v11, %s891_s0 }
  0x46   :  { %807 = vrot.lane.b32.xlu1 %v766_v12, %s892_s28  ;;  %802 = vrot.lane.b32.xlu0 %v771_v11, %s893_s29 }
  0x4a   :  { %817 = vrot.lane.b32.xlu1 %v766_v12, %s895_s4  ;;  %812 = vrot.lane.b32.xlu0 %v771_v11, %s892_s28 }
  0x4e   :  { %827 = vrot.lane.b32.xlu1 %v826_v13, %s894_s30  ;;  %822 = vrot.lane.b32.xlu0 %v771_v11, %s895_s4 }
  0x52   :  { %154 = vrot.lane.b32.xlu1 %v32_v6, %s894_s30  ;;  %832 = vrot.lane.b32.xlu0 %v831_v14, %s894_s30 }
  0x56   :  { %317 = vrot.lane.b32.xlu1 %v961_v8, %s897_s5  ;;  %315 = vrot.lane.b32.xlu0 %v942_v4, %s897_s5 }
  0x5a   :  { %321 = vrot.lane.b32.xlu1 %v188_v7, %s897_s5  ;;  %319 = vrot.lane.b32.xlu0 %v963_v9, %s897_s5 }
  0x5e   :  { %172 = vrot.lane.b32.xlu0 %v32_v6, %s897_s5  ;;  %390 = vperm.xlu1 %836, %v387_v16  }
  0x88   :  { %v1004_v17 = vpop.permute.xlu1 %712  ;;  %v1006_v18 = vpop.permute.xlu0 %702 }
  0x89   :  { %v715_v19 = vunpack.i.h.bf16 %v1004_v17  ;;  %v714_v20 = vunpack.i.l.bf16 %v1004_v17  ;;  %v705_v21 = vunpack.i.h.bf16 %v1006_v18  ;;  %v704_v22 = vunpack.i.l.bf16 %v1006_v18  ;;  %v1098_v18 = vld [vmem:[%s1167_s1] sm:$0xff]  ;;  %s899_s1 = smov [#allocation6]  }
  0x8a   :  { %s622_s9 = sshll.u32 %s899_s1, 4  ;;  %s623_s9 = int_to_ptr.vmem [resolvable:$true] %s622_s9 }
  0x8b   :  { %v50_v23 = vsel %vm48_vm0, %v704_v22, %v705_v21  ;;  %v68_v30 = vsel %vm66_vm1, %v714_v20, %v715_v19  ;;  %s860_s10 = scalar_lea.vmem %s623_s9, 768  ;;  %p865_p9 = scmp.lt.s32.totalorder %s623_s9, %s623_s9 }
  0x8c   :  { %v1015_v24 = vpop.permute.xlu1 %717  ;;  %v1017_v25 = vpop.permute.xlu0 %707  ;;  %v637_v26 = vpack.c.bf16 %v50_v23, %v934_v0  ;;  %p861_p8 = scmp.ne.s32.totalorder %s623_s9, %s860_s10  ;;  %p866_p10 = scmp.lt.s32.totalorder %s860_s10, %s860_s10 }
  0x8d   :  { %v720_v27 = vunpack.i.h.bf16 %v1015_v24  ;;  %v719_v28 = vunpack.i.l.bf16 %v1015_v24  ;;  %v709_v29 = vunpack.i.l.bf16 %v1017_v25 }
  0x8e   :  { %638 = vmatprep.subr.bf16.mxu0 %v637_v26  ;;  %p867_p11 = por %p866_p10, %p865_p9 }
  0x8f   :  { %v49_v31 = vsel %vm48_vm0, %v709_v29, %v704_v22  ;;  %v86_v32 = vsel %vm84_vm2, %v719_v28, %v720_v27 }
  0x90   :  { %v1030_v33 = vpop.permute.xlu1 %727  ;;  %v1032_v34 = vpop.permute.xlu0 %722  ;;  %v639_v35 = vpack.c.bf16 %v49_v31, %v938_v2  ;;  %v641_v36 = vpack.c.bf16 %v86_v32, %v68_v30  ;;  %p868_p12 = pnand %p867_p11, %p861_p8 }
  0x91   :  { %v729_v37 = vunpack.i.l.bf16 %v1030_v33  ;;  %v724_v38 = vunpack.i.l.bf16 %v1032_v34 }
  0x92   :  { %640 = vmatpush1.bf16.msra.mxu0 %v639_v35 }
  0x93   :  { %642 = vmatprep.subr.bf16.mxu0 %v641_v36  ;;  %v67_v39 = vsel %vm66_vm1, %v724_v38, %v714_v20  ;;  %v85_v40 = vsel %vm84_vm2, %v729_v37, %v719_v28  ;;  %v710_v20 = vunpack.i.h.bf16 %v1017_v25 }
  0x94   :  { %v1039_v41 = vpop.permute.xlu1 %737  ;;  %v1041_v42 = vpop.permute.xlu0 %732  ;;  %v643_v43 = vpack.c.bf16 %v85_v40, %v67_v39 }
  0x95   :  { %v740_v44 = vunpack.i.h.bf16 %v1039_v41  ;;  %v739_v45 = vunpack.i.l.bf16 %v1039_v41  ;;  %v735_v46 = vunpack.i.h.bf16 %v1041_v42  ;;  %v734_v47 = vunpack.i.l.bf16 %v1041_v42 }
  0x96   :  { %644 = vmatpush1.bf16.msra.mxu0 %v643_v43 }
  0x97   :  { %v104_v48 = vsel %vm102_vm3, %v734_v47, %v735_v46  ;;  %v122_v49 = vsel %vm120_vm4, %v739_v45, %v740_v44 }
  0x98   :  { %v1053_v50 = vpop.permute.xlu1 %747  ;;  %v1055_v51 = vpop.permute.xlu0 %742  ;;  %v645_v52 = vpack.c.bf16 %v122_v49, %v104_v48 }
  0x99   :  { %v749_v53 = vunpack.i.l.bf16 %v1053_v50  ;;  %v744_v54 = vunpack.i.l.bf16 %v1055_v51 }
  0x9a   :  { %646 = vmatprep.subr.bf16.mxu0 %v645_v52 }
  0x9b   :  { %v103_v55 = vsel %vm102_vm3, %v744_v54, %v734_v47  ;;  %v121_v56 = vsel %vm120_vm4, %v749_v53, %v739_v45 }
  0x9c   :  { %v1061_v57 = vpop.permute.xlu1 %757  ;;  %v1063_v58 = vpop.permute.xlu0 %752  ;;  %v647_v59 = vpack.c.bf16 %v121_v56, %v103_v55 }
  0x9d   :  { %v760_v60 = vunpack.i.h.bf16 %v1061_v57  ;;  %v759_v61 = vunpack.i.l.bf16 %v1061_v57  ;;  %v755_v62 = vunpack.i.h.bf16 %v1063_v58  ;;  %v754_v63 = vunpack.i.l.bf16 %v1063_v58 }
  0x9e   :  { %648 = vmatpush1.bf16.msra.mxu0 %v647_v59 }
  0x9f   :  { %v140_v0 = vsel %vm138_vm6, %v754_v63, %v755_v62  ;;  %v158_v2 = vsel %vm156_vm5, %v759_v61, %v760_v60 }
  0xa0   :  { %v149_v3 = vpop.permute.xlu1 %148  ;;  %v1075_v5 = vpop.permute.xlu0 %762  ;;  %v649_v6 = vpack.c.bf16 %v158_v2, %v140_v0 }
  0xa1   :  { %v157_v7 = vsel %vm156_vm5, %v149_v3, %v759_v61  ;;  %v764_v11 = vunpack.i.l.bf16 %v1075_v5 }
  0xa2   :  { %650 = vmatprep.subr.bf16.mxu0 %v649_v6 }
  0xa3   :  { %v139_v12 = vsel %vm138_vm6, %v764_v11, %v754_v63 }
  0xa4   :  { %v1080_v13 = vpop.permute.xlu1 %170  ;;  %v169_v14 = vpop.permute.xlu0 %168  ;;  %v651_v15 = vpack.c.bf16 %v157_v7, %v139_v12 }
  0xa5   :  { %v176_v16 = vsel %vm174_vm7, %v169_v14, %v1080_v13 }
  0xa6   :  { %652 = vmatpush1.bf16.msra.mxu0 %v651_v15 }
  0xa7   :  { %413 = vmatprep.subr.mxu0 %v176_v16  ;;  %v750_v16 = vunpack.i.h.bf16 %v1053_v50 }
  0xa8   :  { %v773_v22 = vpop.permute.xlu1 %772  ;;  %v768_v23 = vpop.permute.xlu0 %767 }
  0xa9   :  { %v775_v26 = vunpack.i.h.bf16 %v773_v22  ;;  %v774_v28 = vunpack.i.l.bf16 %v773_v22  ;;  %v770_v29 = vunpack.i.h.bf16 %v768_v23  ;;  %v769_v30 = vunpack.i.l.bf16 %v768_v23 }
  0xab   :  { %v204_v31 = vsel %vm48_vm0, %v710_v20, %v769_v30  ;;  %v51_v32 = vsel %vm48_vm0, %v705_v21, %v775_v26  ;;  %v206_v35 = vsel %vm48_vm0, %v770_v29, %v774_v28  ;;  %v205_v36 = vsel %vm48_vm0, %v769_v30, %v770_v29 }
  0xac   :  { %v778_v37 = vpop.permute.xlu1 %777  ;;  %v167_v38 = vpop.permute.xlu0 %166  ;;  %v653_v25 = vpack.c.bf16 %v204_v31, %v942_v4  ;;  %v655_v39 = vpack.c.bf16 %v51_v32, %v936_v1  ;;  %v669_v40 = vpack.c.bf16 %v206_v35, %v963_v9  ;;  %v671_v21 = vpack.c.bf16 %v205_v36, %v961_v8 }
  0xad   :  { %v175_v43 = vsel %vm174_vm7, %v167_v38, %v169_v14  ;;  %v779_v45 = vunpack.i.l.bf16 %v778_v37  ;;  %v730_v1 = vunpack.i.h.bf16 %v1030_v33  ;;  %v725_v9 = vunpack.i.h.bf16 %v1032_v34 }
  0xae   :  { %414 = vmatpush1.msra.mxu0 %v175_v43  ;;  %654 = vmatprep.subr.bf16.mxu1 %v653_v25  ;;  %v780_v49 = vunpack.i.h.bf16 %v778_v37  ;;  %v745_v20 = vunpack.i.h.bf16 %v1055_v51 }
  0xaf   :  { %656 = vmatpush1.bf16.msra.mxu1 %v655_v39  ;;  %670 = vmatprep.subr.bf16.mxu0 %v669_v40  ;;  %v221_v54 = vsel %vm66_vm1, %v725_v9, %v779_v45  ;;  %v765_v40 = vunpack.i.h.bf16 %v1075_v5 }
  0xb0   :  { %v788_v4 = vpop.permute.xlu1 %787  ;;  %v783_v47 = vpop.permute.xlu0 %782  ;;  %634 = vmatmul.mubr.msk.f32.vlgmr.msra.gmra.mrb[0].mxu0 %vm393_vm8, %v1098_v18  ;;  %v222_v33 = vsel %vm66_vm1, %v779_v45, %v780_v49 }
  0xb1   :  { %v789_v48 = vunpack.i.l.bf16 %v788_v4  ;;  %672 = vmatpush1.bf16.msra.mxu0 %v671_v21  ;;  %603 = vmatprep.mubr.f32.mxu0 %v896_v10  ;;  %v790_v52 = vunpack.i.h.bf16 %v788_v4  ;;  %v785_v53 = vunpack.i.h.bf16 %v783_v47  ;;  %v784_v8 = vunpack.i.l.bf16 %v783_v47 }
  0xb3   :  { %v238_v55 = vsel %vm84_vm2, %v730_v1, %v789_v48  ;;  %v239_v34 = vsel %vm84_vm2, %v789_v48, %v790_v52  ;;  %v69_v10 = vsel %vm66_vm1, %v715_v19, %v785_v53  ;;  %v223_v6 = vsel %vm66_vm1, %v780_v49, %v784_v8 }
  0xb4   :  { %v798_v56 = vpop.permute.xlu1 %797  ;;  %v793_v59 = vpop.permute.xlu0 %792  ;;  %v657_v61 = vpack.c.bf16 %v238_v55, %v221_v54  ;;  %v675_v17 = vpack.c.bf16 %v239_v34, %v222_v33 }
  0xb5   :  { %v795_v63 = vunpack.i.h.bf16 %v793_v59  ;;  %v794_v0 = vunpack.i.l.bf16 %v793_v59  ;;  %v799_v2 = vunpack.i.l.bf16 %v798_v56  ;;  %v800_v19 = vunpack.i.h.bf16 %v798_v56 }
  0xb6   :  { %658 = vmatprep.subr.bf16.mxu1 %v657_v61 }
  0xb7   :  { %v87_v3 = vsel %vm84_vm2, %v720_v27, %v795_v63  ;;  %v240_v7 = vsel %vm84_vm2, %v790_v52, %v794_v0  ;;  %v255_v27 = vsel %vm102_vm3, %v745_v20, %v799_v2  ;;  %v256_v51 = vsel %vm102_vm3, %v799_v2, %v800_v19 }
  0xb8   :  { %v808_v11 = vpop.permute.xlu1 %807  ;;  %v803_v12 = vpop.permute.xlu0 %802  ;;  %v659_v14 = vpack.c.bf16 %v87_v3, %v69_v10  ;;  %v673_v15 = vpack.c.bf16 %v240_v7, %v223_v6 }
  0xb9   :  { %v809_v22 = vunpack.i.l.bf16 %v808_v11  ;;  %v810_v23 = vunpack.i.h.bf16 %v808_v11  ;;  %v805_v26 = vunpack.i.h.bf16 %v803_v12  ;;  %v804_v24 = vunpack.i.l.bf16 %v803_v12 }
  0xba   :  { %660 = vmatpush1.bf16.msra.mxu1 %v659_v14  ;;  %674 = vmatprep.subr.bf16.mxu0 %v673_v15 }
  0xbb   :  { %676 = vmatpush1.bf16.msra.mxu0 %v675_v17  ;;  %v272_v28 = vsel %vm120_vm4, %v750_v16, %v809_v22  ;;  %v273_v35 = vsel %vm120_vm4, %v809_v22, %v810_v23  ;;  %v105_v36 = vsel %vm102_vm3, %v735_v46, %v805_v26  ;;  %v257_v25 = vsel %vm102_vm3, %v800_v19, %v804_v24 }
  0xbc   :  { %v818_v29 = vpop.permute.xlu1 %817  ;;  %v813_v30 = vpop.permute.xlu0 %812  ;;  %v661_v31 = vpack.c.bf16 %v272_v28, %v255_v27  ;;  %v679_v47 = vpack.c.bf16 %v273_v35, %v256_v51 }
  0xbd   :  { %v815_v32 = vunpack.i.h.bf16 %v813_v30  ;;  %v814_v50 = vunpack.i.l.bf16 %v813_v30  ;;  %v819_v37 = vunpack.i.l.bf16 %v818_v29  ;;  %v820_v46 = vunpack.i.h.bf16 %v818_v29 }
  0xbe   :  { %662 = vmatprep.subr.bf16.mxu1 %v661_v31 }
  0xbf   :  { %v123_v38 = vsel %vm120_vm4, %v740_v44, %v815_v32  ;;  %v274_v39 = vsel %vm120_vm4, %v810_v23, %v814_v50  ;;  %v289_v44 = vsel %vm138_vm6, %v765_v40, %v819_v37  ;;  %v290_v59 = vsel %vm138_vm6, %v819_v37, %v820_v46 }
  0xc0   :  { %v828_v43 = vpop.permute.xlu1 %827  ;;  %v823_v21 = vpop.permute.xlu0 %822  ;;  %v663_v45 = vpack.c.bf16 %v123_v38, %v105_v36  ;;  %v677_v4 = vpack.c.bf16 %v274_v39, %v257_v25 }
  0xc1   :  { %v830_v1 = vunpack.i.h.bf16 %v828_v43  ;;  %v829_v42 = vunpack.i.l.bf16 %v828_v43  ;;  %v825_v9 = vunpack.i.h.bf16 %v823_v21  ;;  %v824_v41 = vunpack.i.l.bf16 %v823_v21 }
  0xc2   :  { %664 = vmatpush1.bf16.msra.mxu1 %v663_v45  ;;  %678 = vmatprep.subr.bf16.mxu0 %v677_v4 }
  0xc3   :  { %680 = vmatpush1.bf16.msra.mxu0 %v679_v47  ;;  %v306_v48 = vsel %vm156_vm5, %v829_v42, %v830_v1  ;;  %v141_v53 = vsel %vm138_vm6, %v755_v62, %v825_v9  ;;  %v291_v63 = vsel %vm138_vm6, %v820_v46, %v824_v41 }
  0xc4   :  { %v155_v49 = vpop.permute.xlu1 %154  ;;  %v833_v52 = vpop.permute.xlu0 %832  ;;  %v665_v5 = vpack.c.bf16 %v306_v48, %v289_v44 }
  0xc5   :  { %v159_v8 = vsel %vm156_vm5, %v760_v60, %v155_v49  ;;  %v835_v54 = vunpack.i.h.bf16 %v833_v52  ;;  %v834_v55 = vunpack.i.l.bf16 %v833_v52 }
  0xc6   :  { %v667_v56 = vpack.c.bf16 %v159_v8, %v141_v53  ;;  %666 = vmatprep.subr.bf16.mxu1 %v665_v5 }
  0xc7   :  { %v307_v61 = vsel %vm156_vm5, %v830_v1, %v834_v55  ;;  %v308_v0 = vsel %vm156_vm5, %v834_v55, %v835_v54 }
  0xc8   :  { %v683_v33 = vpack.c.bf16 %v307_v61, %v290_v59  ;;  %v318_v58 = vpop.permute.xlu1 %317  ;;  %v316_v34 = vpop.permute.xlu0 %315  ;;  %668 = vmatpush1.bf16.msra.mxu1 %v667_v56  ;;  %v681_v62 = vpack.c.bf16 %v308_v0, %v291_v63 }
  0xc9   :  { %v323_v57 = vsel %vm174_vm7, %v316_v34, %v318_v58 }
  0xca   :  { %484 = vmatprep.subr.mxu1 %v323_v57  ;;  %682 = vmatprep.subr.bf16.mxu0 %v681_v62 }
  0xcb   :  { %684 = vmatpush1.bf16.msra.mxu0 %v683_v33 }
  0xcc   :  { %v322_v60 = vpop.permute.xlu1 %321  ;;  %v320_v10 = vpop.permute.xlu0 %319 }
  0xcd   :  { %v324_v2 = vsel %vm174_vm7, %v318_v58, %v320_v10  ;;  %v325_v3 = vsel %vm174_vm7, %v320_v10, %v322_v60 }
  0xce   :  { %555 = vmatprep.subr.mxu0 %v325_v3 }
  0xcf   :  { %556 = vmatpush1.msra.mxu0 %v324_v2 }
  0xd0   :  { %v173_v6 = vpop.permute.xlu0 %172  ;;  %636 = vmatmul.mubr.msk.f32.vlgmr.msra.gmra.mrb[2].mxu0 %vm393_vm8, %v1098_v18 }
  0xd1   :  { %v177_v7 = vsel %vm174_vm7, %v1080_v13, %v173_v6 }
  0xd2   :  { %485 = vmatpush1.msra.mxu1 %v177_v7 }
  0xd3   :  { %635 = vmatmul.mubr.msk.f32.vlgmr.msra.gmra.mrb[0].mxu1 %vm393_vm8, %v1098_v18 }
  0xdd   :  { %v391_v11 = vpop.permute.xlu1 %390 }
 0x183   :  { %v463_v12 = vpop.f32.mrb[0].mxu0 }
 0x184   :  { %v464_v14 = vadd.f32 %v463_v12, %v391_v11  ;;  %v465_v15 = vpop.f32.mrb[1].mxu0 }
 0x185   :  { %v466_v16 = vadd.f32 %v465_v15, %v391_v11 }
 0x186   :  { %610 = vst [vmem:[#allocation6] sm:$0xff] %v464_v14 }
 0x187   :  { %611 = vst [vmem:[#allocation6 + $0x8] sm:$0xff] %v466_v16 }
 0x1a3   :  { %v605_v20 = vpop.f32.mrb[2].mxu0 }
 0x1a4   :  { %v606_v17 = vadd.f32 %v605_v20, %v391_v11  ;;  %v607_v22 = vpop.f32.mrb[3].mxu0 }
 0x1a5   :  { %v608_v19 = vadd.f32 %v607_v22, %v391_v11 }
 0x1a6   :  { %615 = vst [vmem:[#allocation6 + $0x20] sm:$0xff] %v606_v17  ;;  %v534_v23 = vpop.f32.mrb[0].mxu1 }
 0x1a7   :  { %v535_v13 = vadd.f32 %v534_v23, %v391_v11  ;;  %616 = vst [vmem:[#allocation6 + $0x28] sm:$0xff] %v608_v19  ;;  %v536_v26 = vpop.f32.mrb[1].mxu1 }
 0x1a8   :  { %v537_v24 = vadd.f32 %v536_v26, %v391_v11 }
 0x1a9   :  { %612 = vst [vmem:[#allocation6 + $0x10] sm:$0xff] %v535_v13 }
 0x1aa   :  { %614 = vst [vmem:[#allocation6 + $0x18] sm:$0xff] %v537_v24 }
 0x1ab   :  { %871 = shalt.err (!%p868_p12)
}
 0x1ac   :  { %s872_s13 = scalar_lea.hbm %s1169_s3, 768 }
 0x1ad   :  { %p873_p13 = scmp.ne.s32.totalorder %s1169_s3, %s872_s13  ;;  %p876_p0 = scmp.lt.u32.totalorder %s872_s13, %s1169_s3 }
 0x1af   :  { %p878_p1 = pnand %p876_p0, %p873_p13 }
 0x1b1   :  { %881 = shalt.err (!%p878_p1)
}
 0x1b2   :  { %s900_s18 = smov 384   ;;  %s901_s19 = smov 24  }
 0x1b3   :  { %628 = dma.vmem_to_hbm [thread:$0]  %s623_s9, 768, %s1169_s3, [#allocation5], %s900_s18, %s900_s18, %s901_s19  }
 0x1b4   :  { %884 = dma.done.wait [#allocation5], 768  }
 0x1b5   :  { %885 = vsyncadd [#allocation5], 4294966528 }
 0x1b6   :  { %632 = vsyncpa [#allocation4], 1 }
 0x1b7   :  { %633 = vsyncpa [#allocation5], 1 }

</bundles_post_ra>
